<compile_context>
chip_gen: v7x
topology: tpu7x:2x2x1
jax: 0.10.0
libtpu: 0.0.40
codegen_flags: <defaults>
</compile_context>

<pallas_src>
import functools
import math

import jax
import jax.numpy as jnp
from jax.experimental import pallas as pl
from jax.experimental.pallas import tpu as pltpu


def _split_kernel(x_ref, *out_refs, offsets, sizes):
    """x_ref: (C, post_tile) block in VMEM; out_refs[i]: (sizes[i], post_tile).

    Static slices on the ref are views (no full-tensor load into vregs), so
    each output is a contiguous whole-slab copy.
    """
    for out_ref, off, sz in zip(out_refs, offsets, sizes):
        out_ref[...] = x_ref[off:off + sz, :]


def _choose_post_tile(post, c, dtype_bytes, vmem_budget_bytes=8 * 1024 * 1024):
    """Largest lane-dense tile (multiple of 128) along the flattened trailing
    axis that evenly divides `post` and keeps the double-buffered working set
    (input block + output blocks, x2 for pipelining) under budget (sized for
    v7x's smaller VMEM)."""
    if post % 128 != 0:
        return post  # full extent is always a legal block dim
    # bytes/step ~= 2 (in + out slabs) * 2 (double buffer) * C * tile * dtype
    max_tile = max(128, vmem_budget_bytes // (4 * c * dtype_bytes))
    best = 128
    t = 128
    while t <= post:
        if post % t == 0 and t <= max_tile:
            best = t
        t += 128
    return best


def split_pallas(x, split_list=(3, 1), dim=1):
    """Pallas equivalent of torch.split(x, split_list, dim). Returns a tuple."""
    ndim = x.ndim
    if dim < 0:  # normalize negative dims (e.g. dim=-3 for NCHW channels)
        dim += ndim
    assert 0 <= dim < ndim, f"dim {dim} out of range for rank {ndim}"

    split_list = tuple(int(s) for s in split_list)
    c = x.shape[dim]
    assert sum(split_list) == c, (
        f"split_list {split_list} must sum to x.shape[{dim}]={c}"
    )

    offsets = []
    acc = 0
    for s in split_list:
        offsets.append(acc)
        acc += s
    offsets = tuple(offsets)

    pre = int(math.prod(x.shape[:dim]))        # leading grid axis
    post = int(math.prod(x.shape[dim + 1:]))   # lane-dense trailing axis
    # TODO(synk): if `dim` is the last axis (post == 1) the lane axis degenerates
    # to 1; a lane-split layout would be better, but the module's default
    # (dim=1, NCHW) never hits that case.

    x3 = x.reshape(pre, c, post)

    dtype_bytes = jnp.dtype(x.dtype).itemsize
    post_tile = _choose_post_tile(post, c, dtype_bytes)
    grid = (pre, post // post_tile)

    kernel = functools.partial(_split_kernel, offsets=offsets, sizes=split_list)

    out_shapes = tuple(
        jax.ShapeDtypeStruct((pre, sz, post), x.dtype) for sz in split_list
    )

    in_specs = [
        pl.BlockSpec((None, c, post_tile), lambda p, s: (p, 0, s)),
    ]
    out_specs = tuple(
        pl.BlockSpec((None, sz, post_tile), lambda p, s: (p, 0, s))
        for sz in split_list
    )

    outs = pl.pallas_call(
        kernel,
        out_shape=out_shapes,
        grid=grid,
        in_specs=in_specs,
        out_specs=out_specs,
        compiler_params=pltpu.CompilerParams(
            dimension_semantics=("parallel", "parallel"),
            vmem_limit_bytes=32 * 1024 * 1024,
        ),
    )(x3)

    # Reshape each piece back to the original rank.
    results = []
    for o, sz in zip(outs, split_list):
        shape = tuple(sz if ax == dim else s for ax, s in enumerate(x.shape))
        results.append(o.reshape(shape))
    return tuple(results)


if __name__ == "__main__":
    key = jax.random.PRNGKey(0)
    # NCHW input consistent with the module's default split_list=[3, 1], dim=1.
    x = jax.random.normal(key, (2, 4, 16, 16), dtype=jnp.float32)

    outs = split_pallas(x, split_list=(3, 1), dim=1)
    outs = jax.block_until_ready(outs)

    # Reference semantics of torch.split.
    ref0 = x[:, 0:3, :, :]
    ref1 = x[:, 3:4, :, :]
    assert outs[0].shape == (2, 3, 16, 16) and outs[1].shape == (2, 1, 16, 16)
    assert jnp.array_equal(outs[0], ref0) and jnp.array_equal(outs[1], ref1)

    # Also exercise negative-dim normalization (dim=-3 == channels for NCHW).
    outs_neg = jax.block_until_ready(split_pallas(x, split_list=(3, 1), dim=-3))
    assert jnp.array_equal(outs_neg[0], ref0) and jnp.array_equal(outs_neg[1], ref1)

    print("KERNEL_OK")
</pallas_src>

<mosaic_0001>
module attributes {stable_mosaic.version = 11 : i64} {
  func.func @_split_kernel(%arg0: i32, %arg1: i32, %arg2: memref<1x4x256xf32, #tpu.memory_space<vmem>>, %arg3: memref<1x3x256xf32, #tpu.memory_space<vmem>>, %arg4: memref<1x1x256xf32, #tpu.memory_space<vmem>>) attributes {dimension_semantics = [#tpu.dimension_semantics<parallel>, #tpu.dimension_semantics<parallel>], iteration_bounds = array<i64: 2, 1>, scalar_prefetch = 0 : i64, scratch_operands = 0 : i64, tpu.core_type = #tpu.core_type<tc>, window_params = [{transform_indices = @transform_0, window_bounds = array<i64: 1, 4, 256>}, {transform_indices = @transform_1, window_bounds = array<i64: 1, 3, 256>}, {transform_indices = @transform_2, window_bounds = array<i64: 1, 1, 256>}]} {
    %c0 = arith.constant 0 : index
    %c0_0 = arith.constant 0 : index
    %c0_1 = arith.constant 0 : index
    %0 = vector.load %arg2[%c0, %c0_0, %c0_1] : memref<1x4x256xf32, #tpu.memory_space<vmem>>, vector<1x3x256xf32>
    %1 = vector.shape_cast %0 : vector<1x3x256xf32> to vector<3x256xf32>
    %c0_2 = arith.constant 0 : index
    %c0_3 = arith.constant 0 : index
    %c0_4 = arith.constant 0 : index
    %2 = vector.load %arg3[%c0_2, %c0_3, %c0_4] : memref<1x3x256xf32, #tpu.memory_space<vmem>>, vector<1x3x256xf32>
    %3 = vector.shape_cast %2 : vector<1x3x256xf32> to vector<3x256xf32>
    %4 = vector.shape_cast %1 : vector<3x256xf32> to vector<1x3x256xf32>
    tpu.vector_store %arg3[%c0_2, %c0_3, %c0_4], %4 {strides = array<i32>} : memref<1x3x256xf32, #tpu.memory_space<vmem>>, vector<1x3x256xf32>,
    %c0_5 = arith.constant 0 : index
    %c3 = arith.constant 3 : index
    %c0_6 = arith.constant 0 : index
    %5 = vector.load %arg2[%c0_5, %c3, %c0_6] : memref<1x4x256xf32, #tpu.memory_space<vmem>>, vector<1x1x256xf32>
    %6 = vector.shape_cast %5 : vector<1x1x256xf32> to vector<1x256xf32>
    %c0_7 = arith.constant 0 : index
    %c0_8 = arith.constant 0 : index
    %c0_9 = arith.constant 0 : index
    %7 = vector.load %arg4[%c0_7, %c0_8, %c0_9] : memref<1x1x256xf32, #tpu.memory_space<vmem>>, vector<1x1x256xf32>
    %8 = vector.shape_cast %7 : vector<1x1x256xf32> to vector<1x256xf32>
    %9 = vector.shape_cast %6 : vector<1x256xf32> to vector<1x1x256xf32>
    tpu.vector_store %arg4[%c0_7, %c0_8, %c0_9], %9 {strides = array<i32>} : memref<1x1x256xf32, #tpu.memory_space<vmem>>, vector<1x1x256xf32>,
    return
  }
  func.func @transform_0(%arg0: i32, %arg1: i32) -> (i32, i32, i32) {
    %c0_i32 = arith.constant 0 : i32
    %c0_i32_0 = arith.constant 0 : i32
    return %arg0, %c0_i32, %arg1 : i32, i32, i32
  }
  func.func @transform_1(%arg0: i32, %arg1: i32) -> (i32, i32, i32) {
    %c0_i32 = arith.constant 0 : i32
    %c0_i32_0 = arith.constant 0 : i32
    return %arg0, %c0_i32, %arg1 : i32, i32, i32
  }
  func.func @transform_2(%arg0: i32, %arg1: i32) -> (i32, i32, i32) {
    %c0_i32 = arith.constant 0 : i32
    %c0_i32_0 = arith.constant 0 : i32
    return %arg0, %c0_i32, %arg1 : i32, i32, i32
  }
}

</mosaic_0001>

<bundles_post_ra>
// kernel: tpu_custom_call.1
= control target key start
LH: loop header
LB: loop body
LE: loop exit
PB: predicated region body
PF: predicated region fallthrough
CT: control target
= control target key end

     0   :  { %8 = vsyncpa [#allocation3], 0  ;;  %s756_s0 = inlined_call_operand.hbm [shape: f32[2,4,256], index: 0, kind: input, shape index: {}]   ;;  %s757_s1 = inlined_call_operand.vmem [shape: f32[2,3,256], index: 1, kind: output, shape index: {0}]   ;;  %s758_s2 = inlined_call_operand.hbm [shape: f32[2,1,256], index: 2, kind: output, shape index: {1}]  }
   0x1   :  { %10 = vsyncpa [#allocation3 + $0x1], 0 }
   0x2   :  { %11 = vsyncpa [#allocation4], 0 }
   0x3   :  { %13 = vsyncpa [#allocation4 + $0x1], 0  ;;  %s578_s9 = smov 0   ;;  %s580_s10 = smov 0  }
   0x4   :  { %s582_s11 = smov 0   ;;  %s584_s12 = smov 0  }
   0x5   :  { %s586_s13 = smov 0   ;;  %s588_s14 = smov 0  }
   0x6 LB: > { %s364_s15 = sadd.s32 4294967295, %s559_s14   ;;  %s365_s16 = sadd.s32 4294967294, %s559_s14   ;;  %s559_s14 = sphi %s588_s14, %s19_s14   ;;  %s555_s13 = sphi %s586_s13, %s774_s13   ;;  %s551_s12 = sphi %s584_s12, %s773_s12   ;;  %s547_s11 = sphi %s582_s11, %s772_s11   ;;  %s543_s10 = sphi %s580_s10, %s771_s10   ;;  %s539_s9 = sphi %s578_s9, %s770_s9  }
   0x7   : > { %s31_s17 = sadd.s32 1, %s555_s13  ;;  %s40_s18 = sadd.s32 1, %s547_s11 }
   0x8   : > { %p33_p0 = scmp.ge.s32.totalorder %s31_s17, 2  ;;  %p47_p1 = scmp.ne.s32.totalorder %s547_s11, %s543_s10 }
   0x9   : > { %p48_p2 = scmp.eq.s32.totalorder %s559_s14, 0  ;;  %p53_p3 = scmp.ne.s32.totalorder %s543_s10, %s539_s9 }
   0xa   : > { %s776_s17 = smov (%p33_p0, %s31_s17), 0  ;;  %p54_p5 = scmp.eq.s32.totalorder %s364_s15, 0 }
   0xb   : > { %p619_p4 = por %p48_p2, %p47_p1  ;;  %s35_s20 = ssub.s32 %s555_s13, %s776_s17 }
   0xc   : > { %p107_p6 = scmp.eq.s32.totalorder %s364_s15, 1  ;;  %p38_p7 = scmp.eq.s32.totalorder %s35_s20, 0 }
   0xd   : > { %p625_p8 = por %p54_p5, %p53_p3  ;;  %p113_p10 = scmp.eq.s32.totalorder %s365_s16, 1 }
   0xe   : > { %p629_p9 = por %p107_p6, %p47_p1  ;;  %p397_p13 = scmp.lt.s32.totalorder %s559_s14, 2 }
   0xf   : > { %s634_s23 = scalar_select %p38_p7, %s547_s11, %s40_s18  }
  0x10   : > { %s762_s22 = scalar_select %p629_p9, 1, 0 }
  0x11   : > { %p636_p11 = por %p113_p10, %p53_p3  ;;  %s133_s25 = sand.u32 1, %s547_s11  }
  0x12   : > { %s368_s26 = sshll.u32 %s133_s25, 3  ;;  %s382_s27 = sshll.u32 %s555_s13, 7 }
  0x13   : > { %s763_s24 = scalar_select %p636_p11, 1, 0 }
  0x14   : > { %s647_s30 = scalar_lea.hbm %s756_s0, %s382_s27  ;;  %s137_s3 = scalar_lea.vmem [#allocation2], %s368_s26 }
  0x15   : > { %s147_s4 = sshll.u32 %s137_s3, 4  ;;  %p653_p0 = pnand %p397_p13, %p619_p4  ;;  %s649_s4 = int_to_ptr.vmem [resolvable:$true] %s147_s4 }
  0x16   : > { %s134_s6 = scalar_lea.sflag [#allocation3], %s133_s25  ;;  %s447_s7 = scalar_lea.hbm %s647_s30, 128 }
  0x17   : > { %p448_p3 = scmp.ne.s32.totalorder %s647_s30, %s447_s7  ;;  %p449_p5 = pneg %p653_p0 }
  0x18   : > { %s452_s16 = scalar_lea.hbm %s756_s0, 256  ;;  %p453_p4 = scmp.lt.u32.totalorder %s647_s30, %s756_s0 }
  0x19   : > { %p450_p6 = pnand %p449_p5, %p448_p3  ;;  %p454_p10 = scmp.lt.u32.totalorder %s452_s16, %s447_s7 }
  0x1a   : > { %p456_p12 = scmp.lt.u32.totalorder %s447_s7, %s647_s30 }
  0x1b   : > { %p451_p7 = pneg %p450_p6  ;;  %p455_p13 = por %p454_p10, %p453_p4 }
  0x1d   : > { %p457_p1 = por %p456_p12, %p455_p13 }
  0x1f   : > { %p458_p2 = pnand %p457_p1, %p451_p7 }
  0x21   : > { %461 = shalt.err (!%p458_p2)
}
  0x22   : > { %s462_s20 = scalar_lea.vmem %s649_s4, 128  ;;  %s561_s25 = smov [#allocation2]  }
  0x23   : > { %p463_p3 = scmp.ne.s32.totalorder %s649_s4, %s462_s20  ;;  %s467_s26 = sshll.u32 %s561_s25, 4  ;;  %s468_s26 = int_to_ptr.vmem [resolvable:$false] %s467_s26 }
  0x24   : > { %s469_s27 = scalar_lea.vmem %s468_s26, 256  ;;  %p470_p9 = scmp.lt.s32.totalorder %s649_s4, %s468_s26 }
  0x25   : > { %p465_p6 = pnand %p463_p3, %p449_p5  ;;  %p471_p4 = scmp.lt.s32.totalorder %s469_s27, %s462_s20 }
  0x27   : > { %p466_p11 = pneg %p465_p6  ;;  %p472_p10 = por %p471_p4, %p470_p9 }
  0x29   : > { %p473_p12 = pnand %p472_p10, %p466_p11 }
  0x2b   : > { %476 = shalt.err (!%p473_p12)
}
  0x2c   : > { %392 = dma.hbm_to_vmem [thread:$0]  (!%p653_p0), %s647_s30, 128, %s649_s4, %s134_s6  }
  0x2d   : > { %p765_p1 = scmp.lt.s32.totalorder %s559_s14, 3  ;;  %p766_p2 = scmp.ge.s32.totalorder %s559_s14, 1 }
  0x2f   : > { %p153_p5 = pnand %p766_p2, %p765_p1 }
  0x30   : > { %s689_s28 = sand.u32 (!%p153_p5), 1, %s543_s10  }
  0x31   : > { %156 = sbr.rel (%p153_p5) target bundleno = 85 (0x55), region = 24  ;;  %s372_s29 = sshll.u32 (!%p153_p5), %s689_s28, 3 }
  0x32   : > { %s159_s3 = scalar_lea.sflag (!%p153_p5), [#allocation3], %s689_s28  ;;  %s162_s7 = scalar_lea.vmem (!%p153_p5), [#allocation2], %s372_s29 }
  0x38   : > { %530 = dma.done.wait (%p625_p8), %s159_s3, 128  }
  0x39   : > { %532 = vsyncadd (%p625_p8), %s159_s3, 4294967168  ;;  %s373_s30 = sshll.u32 %s689_s28, 1  ;;  %p194_p9 = scmp.lt.s32.totalorder %s551_s12, 1  ;;  %v208_v0 = vlaneseq  ;;  %v376_v1 = vld [vmem:[%s162_s7 + $0x3] ss:$4 sm:$0x3] }
  0x3a   : > { %s191_s4 = scalar_lea.vmem [#allocation5], %s373_s30  ;;  %s384_s6 = sshll.u32 %s551_s12, 5  ;;  %v204_v2 = vld [vmem:[%s162_s7] sm:$0x77] }
  0x3b   : > { %s243_s5 = sshll.u32 %s191_s4, 4  ;;  %s778_s12 = smov (!%p194_p9, %s551_s12), 1  ;;  %vm210_vm0 = vcmp.lt.s32.totalorder %v208_v0, 256  ;;  %s701_s5 = int_to_ptr.vmem [resolvable:$true] %s243_s5 }
  0x3c   : > { %s383_s21 = sshll.u32 %s778_s12, 3  ;;  %s706_s16 = scalar_lea.hbm %s758_s2, %s384_s6  ;;  %212 = vst.msk [vmem:[%s191_s4] sm:$0x3] %vm210_vm0, %v376_v1 }
  0x3d   : > { %s201_s20 = scalar_lea.vmem %s757_s1, %s383_s21  ;;  %s223_s25 = scalar_lea.sflag [#allocation4], %s689_s28 }
  0x3e   : > { %205 = vst [vmem:[%s201_s20] sm:$0x77] %v204_v2  ;;  %s477_s26 = scalar_lea.vmem %s701_s5, 32  ;;  %p767_p11 = scmp.ne.s32.totalorder %s762_s22, 0 }
  0x3f   : > { %p478_p8 = scmp.ne.s32.totalorder %s701_s5, %s477_s26  ;;  %s562_s12 = smov [#allocation5]  }
  0x40   : > { %s481_s27 = sshll.u32 %s562_s12, 4  ;;  %s482_s27 = int_to_ptr.vmem [resolvable:$false] %s481_s27 }
  0x41   : > { %p479_p0 = pnand %p478_p8, %p767_p11  ;;  %s483_s29 = scalar_lea.vmem %s482_s27, 64 }
  0x42   : > { %p484_p13 = scmp.lt.s32.totalorder %s701_s5, %s482_s27  ;;  %p485_p3 = scmp.lt.s32.totalorder %s483_s29, %s477_s26 }
  0x43   : > { %p480_p7 = pneg %p479_p0 }
  0x44   : > { %p486_p6 = por %p485_p3, %p484_p13 }
  0x46   : > { %p487_p4 = pnand %p486_p6, %p480_p7 }
  0x48   : > { %490 = shalt.err (!%p487_p4)
}
  0x49   : > { %s491_s28 = scalar_lea.hbm %s706_s16, 32  ;;  %s495_s30 = scalar_lea.hbm %s758_s2, 64 }
  0x4a   : > { %p492_p10 = scmp.ne.s32.totalorder %s706_s16, %s491_s28  ;;  %p496_p2 = scmp.lt.u32.totalorder %s706_s16, %s758_s2 }
  0x4b   : > { %p497_p5 = scmp.lt.u32.totalorder %s495_s30, %s491_s28  ;;  %p499_p8 = scmp.lt.u32.totalorder %s491_s28, %s706_s16 }
  0x4c   : > { %p493_p12 = pnand %p492_p10, %p767_p11 }
  0x4d   : > { %p498_p9 = por %p497_p5, %p496_p2 }
  0x4e   : > { %p494_p1 = pneg %p493_p12 }
  0x4f   : > { %p500_p0 = por %p499_p8, %p498_p9 }
  0x51   : > { %p501_p7 = pnand %p500_p0, %p494_p1 }
  0x53   : > { %504 = shalt.err (!%p501_p7)
}
  0x54   : > { %387 = dma.vmem_to_hbm [thread:$0]  (%p767_p11), %s701_s5, 32, %s706_s16, %s223_s25  }
  0x55 PF: > { %s267_s21 = sand.u32 1, %s539_s9   ;;  %p768_p13 = scmp.ne.s32.totalorder %s763_s24, 0 }
  0x56   : > { %p769_p3 = scmp.ge.s32.totalorder %s559_s14, 2  ;;  %s268_s8 = scalar_lea.sflag [#allocation4], %s267_s21 }
  0x58   : > { %p394_p6 = pnand %p769_p3, %p768_p13 }
  0x5a   : > { %534 = dma.done.wait (!%p394_p6), %s268_s8, 32  }
  0x5b   : > { %536 = vsyncadd (!%p394_p6), %s268_s8, 4294967264  ;;  %s19_s14 = sadd.s32 1, %s559_s14   ;;  %s770_s9 = smov %s543_s10 }
  0x5c   : > { %p16_p4 = scmp.ge.s32.totalorder %s19_s14, 4   ;;  %s771_s10 = smov %s547_s11 }
  0x5d   : > { %s772_s11 = smov %s634_s23  ;;  %s773_s12 = smov %s555_s13 }
  0x5e   : > { %s774_s13 = smov %s776_s17  ;;  %18 = sbr.rel (!%p16_p4) target bundleno = 6 (0x6), region = 82 }
  0x65   :  { %273 = vsyncpa [#allocation3], 1 }
  0x66   :  { %275 = vsyncpa [#allocation3 + $0x1], 1 }
  0x67   :  { %276 = vsyncpa [#allocation4], 1 }
  0x68   :  { %278 = vsyncpa [#allocation4 + $0x1], 1 }

</bundles_post_ra>
